<compile_context>
chip_gen: v5e
topology: v5e:2x2
jax: 0.10.0
libtpu: 0.0.40
codegen_flags: <defaults>
</compile_context>

<pallas_src>
import functools

import jax
import jax.numpy as jnp
from jax.experimental import pallas as pl
from jax.experimental.pallas import tpu as pltpu


def _rnn_kernel(x_ref, wih_ref, whh_ref, bias_ref, wfc_ref, bfc_ref, out_ref,
                *, T, B, H_pad, I):
    # ---- Input projection for ALL timesteps (independent of h, so it stays off
    # the serial dependence chain). ----
    if I == 1:
        # Degenerate K=1 contraction: do it on the VPU as a broadcast multiply
        # instead of wasting an MXU pass with a 1-deep (zero-padded) contraction.
        xw = x_ref[...] * wih_ref[...] + bias_ref[...]            # (T*B, H_pad)
    else:
        xw = (jnp.dot(x_ref[...], wih_ref[...],
                      preferred_element_type=jnp.float32)
              + bias_ref[...])                                    # (T*B, H_pad)
    # Leading-axis slicing keeps each per-step tile sublane/lane aligned.
    xw = xw.reshape(T, B, H_pad)                                  # (T, B, H_pad)

    # ---- Serial ReLU recurrence; hidden state carried in vregs. ----
    h = jnp.zeros((B, H_pad), jnp.float32)
    for t in range(T):          # static unroll; fine for small T (<= ~64)
        pre = xw[t] + jnp.dot(h, whh_ref[...],
                              preferred_element_type=jnp.float32)
        h = jnp.maximum(pre, 0.0)

    # ---- Final FC on the last hidden state (lane-padded output -> dense vst). ----
    out_ref[...] = (jnp.dot(h, wfc_ref[...], preferred_element_type=jnp.float32)
                    + bfc_ref[...])                               # (B, O_pad)


def _round_up(n, m):
    return ((n + m - 1) // m) * m


@jax.jit
def simple_rnn_forward(x_btI, w_ih, w_hh, b_ih, b_hh, w_fc, b_fc):
    """x_btI: (B, T, I) float32 (batch_first, like PyTorch)."""
    B, T, I = x_btI.shape
    assert T >= 1, "sequence length must be >= 1"
    H = w_hh.shape[0]
    O = w_fc.shape[0]
    H_pad = _round_up(H, 128)     # lane-align hidden dim (zero pad is inert)
    O_pad = _round_up(O, 128)     # lane-dense output store
    B_pad = _round_up(B, 8)       # f32 sublane alignment (padded rows sliced off)

    # One-time (jitted) glue: pad batch, time-major layout, pre-transposed +
    # zero-padded weights, fused recurrent bias.
    x = x_btI.astype(jnp.float32)
    if B_pad != B:
        x = jnp.pad(x, ((0, B_pad - B), (0, 0), (0, 0)))
    x_flat = jnp.transpose(x, (1, 0, 2)).reshape(T * B_pad, I)

    wih_p = jnp.zeros((I, H_pad), jnp.float32).at[:, :H].set(
        w_ih.T.astype(jnp.float32))
    whh_p = jnp.zeros((H_pad, H_pad), jnp.float32).at[:H, :H].set(
        w_hh.T.astype(jnp.float32))
    bias_p = jnp.zeros((1, H_pad), jnp.float32).at[0, :H].set(
        (b_ih + b_hh).astype(jnp.float32))
    wfc_p = jnp.zeros((H_pad, O_pad), jnp.float32).at[:H, :O].set(
        w_fc.T.astype(jnp.float32))
    bfc_p = jnp.zeros((1, O_pad), jnp.float32).at[0, :O].set(
        b_fc.astype(jnp.float32))

    kernel = functools.partial(_rnn_kernel, T=T, B=B_pad, H_pad=H_pad, I=I)

    out_pad = pl.pallas_call(
        kernel,
        out_shape=jax.ShapeDtypeStruct((B_pad, O_pad), jnp.float32),
        in_specs=[pl.BlockSpec(memory_space=pltpu.MemorySpace.VMEM)
                  for _ in range(6)],
        out_specs=pl.BlockSpec(memory_space=pltpu.MemorySpace.VMEM),
    )(x_flat, wih_p, whh_p, bias_p, wfc_p, bfc_p)

    return out_pad[:B, :O]


def reference_forward(x, w_ih, w_hh, b_ih, b_hh, w_fc, b_fc):
    B, T, I = x.shape
    H = w_hh.shape[0]
    h = jnp.zeros((B, H), jnp.float32)
    for t in range(T):
        h = jax.nn.relu(x[:, t, :] @ w_ih.T + b_ih + h @ w_hh.T + b_hh)
    return h @ w_fc.T + b_fc


if __name__ == "__main__":
    # Module defaults: input_size=1, hidden_size=50, output_size=1.
    B, T, I, H, O = 8, 8, 1, 50, 1

    key = jax.random.PRNGKey(0)
    ks = jax.random.split(key, 8)
    bound = 1.0 / jnp.sqrt(H)  # matches PyTorch uniform(-1/sqrt(H), 1/sqrt(H))
    w_ih = jax.random.uniform(ks[0], (H, I), jnp.float32, -bound, bound)
    w_hh = jax.random.uniform(ks[1], (H, H), jnp.float32, -bound, bound)
    b_ih = jax.random.uniform(ks[2], (H,), jnp.float32, -bound, bound)
    b_hh = jax.random.uniform(ks[3], (H,), jnp.float32, -bound, bound)
    w_fc = jax.random.uniform(ks[4], (O, H), jnp.float32, -bound, bound)
    b_fc = jax.random.uniform(ks[5], (O,), jnp.float32, -bound, bound)
    x = jax.random.normal(ks[6], (B, T, I), jnp.float32)

    out = simple_rnn_forward(x, w_ih, w_hh, b_ih, b_hh, w_fc, b_fc)
    out = jax.block_until_ready(out)

    ref = reference_forward(x, w_ih, w_hh, b_ih, b_hh, w_fc, b_fc)
    assert out.shape == (B, O)
    assert jnp.allclose(out, ref, atol=1e-5, rtol=1e-5)

    print("KERNEL_OK")
</pallas_src>

<mosaic_0001>
module attributes {stable_mosaic.version = 11 : i64} {
  func.func @_rnn_kernel(%arg0: memref<64x1xf32, #tpu.memory_space<vmem>>, %arg1: memref<1x128xf32, #tpu.memory_space<vmem>>, %arg2: memref<128x128xf32, #tpu.memory_space<vmem>>, %arg3: memref<1x128xf32, #tpu.memory_space<vmem>>, %arg4: memref<128x128xf32, #tpu.memory_space<vmem>>, %arg5: memref<1x128xf32, #tpu.memory_space<vmem>>, %arg6: memref<8x128xf32, #tpu.memory_space<vmem>>) attributes {dimension_semantics = [], scalar_prefetch = 0 : i64, scratch_operands = 0 : i64, tpu.core_type = #tpu.core_type<tc>} {
    %c0 = arith.constant 0 : index
    %c0_0 = arith.constant 0 : index
    %0 = vector.load %arg0[%c0, %c0_0] : memref<64x1xf32, #tpu.memory_space<vmem>>, vector<64x1xf32>
    %c0_1 = arith.constant 0 : index
    %c0_2 = arith.constant 0 : index
    %1 = vector.load %arg1[%c0_1, %c0_2] : memref<1x128xf32, #tpu.memory_space<vmem>>, vector<1x128xf32>
    %2 = vector.broadcast %0 : vector<64x1xf32> to vector<64x128xf32>
    %3 = vector.broadcast %1 : vector<1x128xf32> to vector<64x128xf32>
    %4 = arith.mulf %2, %3 : vector<64x128xf32>
    %c0_3 = arith.constant 0 : index
    %c0_4 = arith.constant 0 : index
    %5 = vector.load %arg3[%c0_3, %c0_4] : memref<1x128xf32, #tpu.memory_space<vmem>>, vector<1x128xf32>
    %6 = vector.broadcast %5 : vector<1x128xf32> to vector<64x128xf32>
    %7 = arith.addf %4, %6 : vector<64x128xf32>
    %8 = vector.shape_cast %7 : vector<64x128xf32> to vector<8x8x128xf32>
    %cst = arith.constant 0.000000e+00 : f32
    %9 = vector.broadcast %cst : f32 to vector<8x128xf32>
    %10 = vector.extract_strided_slice %8 {offsets = [0, 0, 0], sizes = [1, 8, 128], strides = [1, 1, 1]} : vector<8x8x128xf32> to vector<1x8x128xf32>
    %11 = vector.shape_cast %10 : vector<1x8x128xf32> to vector<8x128xf32>
    %c0_5 = arith.constant 0 : index
    %c0_6 = arith.constant 0 : index
    %12 = vector.load %arg2[%c0_5, %c0_6] : memref<128x128xf32, #tpu.memory_space<vmem>>, vector<128x128xf32>
    %cst_7 = arith.constant dense<0.000000e+00> : vector<8x128xf32>
    %13 = tpu.matmul %9, %12, %cst_7 {dimension_numbers = #tpu.dot_dimension_numbers<[1], [0], [0], [1], [0, 0, 1, 1], [], []>} : vector<8x128xf32>, vector<128x128xf32>, vector<8x128xf32> -> vector<8x128xf32>
    %14 = arith.addf %11, %13 : vector<8x128xf32>
    %cst_8 = arith.constant 0.000000e+00 : f32
    %15 = vector.broadcast %cst_8 : f32 to vector<8x128xf32>
    %16 = arith.maximumf %14, %15 : vector<8x128xf32>
    %17 = vector.extract_strided_slice %8 {offsets = [1, 0, 0], sizes = [1, 8, 128], strides = [1, 1, 1]} : vector<8x8x128xf32> to vector<1x8x128xf32>
    %18 = vector.shape_cast %17 : vector<1x8x128xf32> to vector<8x128xf32>
    %c0_9 = arith.constant 0 : index
    %c0_10 = arith.constant 0 : index
    %19 = vector.load %arg2[%c0_9, %c0_10] : memref<128x128xf32, #tpu.memory_space<vmem>>, vector<128x128xf32>
    %cst_11 = arith.constant dense<0.000000e+00> : vector<8x128xf32>
    %20 = tpu.matmul %16, %19, %cst_11 {dimension_numbers = #tpu.dot_dimension_numbers<[1], [0], [0], [1], [0, 0, 1, 1], [], []>} : vector<8x128xf32>, vector<128x128xf32>, vector<8x128xf32> -> vector<8x128xf32>
    %21 = arith.addf %18, %20 : vector<8x128xf32>
    %cst_12 = arith.constant 0.000000e+00 : f32
    %22 = vector.broadcast %cst_12 : f32 to vector<8x128xf32>
    %23 = arith.maximumf %21, %22 : vector<8x128xf32>
    %24 = vector.extract_strided_slice %8 {offsets = [2, 0, 0], sizes = [1, 8, 128], strides = [1, 1, 1]} : vector<8x8x128xf32> to vector<1x8x128xf32>
    %25 = vector.shape_cast %24 : vector<1x8x128xf32> to vector<8x128xf32>
    %c0_13 = arith.constant 0 : index
    %c0_14 = arith.constant 0 : index
    %26 = vector.load %arg2[%c0_13, %c0_14] : memref<128x128xf32, #tpu.memory_space<vmem>>, vector<128x128xf32>
    %cst_15 = arith.constant dense<0.000000e+00> : vector<8x128xf32>
    %27 = tpu.matmul %23, %26, %cst_15 {dimension_numbers = #tpu.dot_dimension_numbers<[1], [0], [0], [1], [0, 0, 1, 1], [], []>} : vector<8x128xf32>, vector<128x128xf32>, vector<8x128xf32> -> vector<8x128xf32>
    %28 = arith.addf %25, %27 : vector<8x128xf32>
    %cst_16 = arith.constant 0.000000e+00 : f32
    %29 = vector.broadcast %cst_16 : f32 to vector<8x128xf32>
    %30 = arith.maximumf %28, %29 : vector<8x128xf32>
    %31 = vector.extract_strided_slice %8 {offsets = [3, 0, 0], sizes = [1, 8, 128], strides = [1, 1, 1]} : vector<8x8x128xf32> to vector<1x8x128xf32>
    %32 = vector.shape_cast %31 : vector<1x8x128xf32> to vector<8x128xf32>
    %c0_17 = arith.constant 0 : index
    %c0_18 = arith.constant 0 : index
    %33 = vector.load %arg2[%c0_17, %c0_18] : memref<128x128xf32, #tpu.memory_space<vmem>>, vector<128x128xf32>
    %cst_19 = arith.constant dense<0.000000e+00> : vector<8x128xf32>
    %34 = tpu.matmul %30, %33, %cst_19 {dimension_numbers = #tpu.dot_dimension_numbers<[1], [0], [0], [1], [0, 0, 1, 1], [], []>} : vector<8x128xf32>, vector<128x128xf32>, vector<8x128xf32> -> vector<8x128xf32>
    %35 = arith.addf %32, %34 : vector<8x128xf32>
    %cst_20 = arith.constant 0.000000e+00 : f32
    %36 = vector.broadcast %cst_20 : f32 to vector<8x128xf32>
    %37 = arith.maximumf %35, %36 : vector<8x128xf32>
    %38 = vector.extract_strided_slice %8 {offsets = [4, 0, 0], sizes = [1, 8, 128], strides = [1, 1, 1]} : vector<8x8x128xf32> to vector<1x8x128xf32>
    %39 = vector.shape_cast %38 : vector<1x8x128xf32> to vector<8x128xf32>
    %c0_21 = arith.constant 0 : index
    %c0_22 = arith.constant 0 : index
    %40 = vector.load %arg2[%c0_21, %c0_22] : memref<128x128xf32, #tpu.memory_space<vmem>>, vector<128x128xf32>
    %cst_23 = arith.constant dense<0.000000e+00> : vector<8x128xf32>
    %41 = tpu.matmul %37, %40, %cst_23 {dimension_numbers = #tpu.dot_dimension_numbers<[1], [0], [0], [1], [0, 0, 1, 1], [], []>} : vector<8x128xf32>, vector<128x128xf32>, vector<8x128xf32> -> vector<8x128xf32>
    %42 = arith.addf %39, %41 : vector<8x128xf32>
    %cst_24 = arith.constant 0.000000e+00 : f32
    %43 = vector.broadcast %cst_24 : f32 to vector<8x128xf32>
    %44 = arith.maximumf %42, %43 : vector<8x128xf32>
    %45 = vector.extract_strided_slice %8 {offsets = [5, 0, 0], sizes = [1, 8, 128], strides = [1, 1, 1]} : vector<8x8x128xf32> to vector<1x8x128xf32>
    %46 = vector.shape_cast %45 : vector<1x8x128xf32> to vector<8x128xf32>
    %c0_25 = arith.constant 0 : index
    %c0_26 = arith.constant 0 : index
    %47 = vector.load %arg2[%c0_25, %c0_26] : memref<128x128xf32, #tpu.memory_space<vmem>>, vector<128x128xf32>
    %cst_27 = arith.constant dense<0.000000e+00> : vector<8x128xf32>
    %48 = tpu.matmul %44, %47, %cst_27 {dimension_numbers = #tpu.dot_dimension_numbers<[1], [0], [0], [1], [0, 0, 1, 1], [], []>} : vector<8x128xf32>, vector<128x128xf32>, vector<8x128xf32> -> vector<8x128xf32>
    %49 = arith.addf %46, %48 : vector<8x128xf32>
    %cst_28 = arith.constant 0.000000e+00 : f32
    %50 = vector.broadcast %cst_28 : f32 to vector<8x128xf32>
    %51 = arith.maximumf %49, %50 : vector<8x128xf32>
    %52 = vector.extract_strided_slice %8 {offsets = [6, 0, 0], sizes = [1, 8, 128], strides = [1, 1, 1]} : vector<8x8x128xf32> to vector<1x8x128xf32>
    %53 = vector.shape_cast %52 : vector<1x8x128xf32> to vector<8x128xf32>
    %c0_29 = arith.constant 0 : index
    %c0_30 = arith.constant 0 : index
    %54 = vector.load %arg2[%c0_29, %c0_30] : memref<128x128xf32, #tpu.memory_space<vmem>>, vector<128x128xf32>
    %cst_31 = arith.constant dense<0.000000e+00> : vector<8x128xf32>
    %55 = tpu.matmul %51, %54, %cst_31 {dimension_numbers = #tpu.dot_dimension_numbers<[1], [0], [0], [1], [0, 0, 1, 1], [], []>} : vector<8x128xf32>, vector<128x128xf32>, vector<8x128xf32> -> vector<8x128xf32>
    %56 = arith.addf %53, %55 : vector<8x128xf32>
    %cst_32 = arith.constant 0.000000e+00 : f32
    %57 = vector.broadcast %cst_32 : f32 to vector<8x128xf32>
    %58 = arith.maximumf %56, %57 : vector<8x128xf32>
    %59 = vector.extract_strided_slice %8 {offsets = [7, 0, 0], sizes = [1, 8, 128], strides = [1, 1, 1]} : vector<8x8x128xf32> to vector<1x8x128xf32>
    %60 = vector.shape_cast %59 : vector<1x8x128xf32> to vector<8x128xf32>
    %c0_33 = arith.constant 0 : index
    %c0_34 = arith.constant 0 : index
    %61 = vector.load %arg2[%c0_33, %c0_34] : memref<128x128xf32, #tpu.memory_space<vmem>>, vector<128x128xf32>
    %cst_35 = arith.constant dense<0.000000e+00> : vector<8x128xf32>
    %62 = tpu.matmul %58, %61, %cst_35 {dimension_numbers = #tpu.dot_dimension_numbers<[1], [0], [0], [1], [0, 0, 1, 1], [], []>} : vector<8x128xf32>, vector<128x128xf32>, vector<8x128xf32> -> vector<8x128xf32>
    %63 = arith.addf %60, %62 : vector<8x128xf32>
    %cst_36 = arith.constant 0.000000e+00 : f32
    %64 = vector.broadcast %cst_36 : f32 to vector<8x128xf32>
    %65 = arith.maximumf %63, %64 : vector<8x128xf32>
    %c0_37 = arith.constant 0 : index
    %c0_38 = arith.constant 0 : index
    %66 = vector.load %arg4[%c0_37, %c0_38] : memref<128x128xf32, #tpu.memory_space<vmem>>, vector<128x128xf32>
    %cst_39 = arith.constant dense<0.000000e+00> : vector<8x128xf32>
    %67 = tpu.matmul %65, %66, %cst_39 {dimension_numbers = #tpu.dot_dimension_numbers<[1], [0], [0], [1], [0, 0, 1, 1], [], []>} : vector<8x128xf32>, vector<128x128xf32>, vector<8x128xf32> -> vector<8x128xf32>
    %c0_40 = arith.constant 0 : index
    %c0_41 = arith.constant 0 : index
    %68 = vector.load %arg5[%c0_40, %c0_41] : memref<1x128xf32, #tpu.memory_space<vmem>>, vector<1x128xf32>
    %69 = vector.broadcast %68 : vector<1x128xf32> to vector<8x128xf32>
    %70 = arith.addf %67, %69 : vector<8x128xf32>
    %c0_42 = arith.constant 0 : index
    %c0_43 = arith.constant 0 : index
    %71 = vector.load %arg6[%c0_42, %c0_43] : memref<8x128xf32, #tpu.memory_space<vmem>>, vector<8x128xf32>
    tpu.vector_store %arg6[%c0_42, %c0_43], %70 {strides = array<i32>} : memref<8x128xf32, #tpu.memory_space<vmem>>, vector<8x128xf32>,
    return
  }
}

</mosaic_0001>

<bundles_post_ra>
// kernel: simple_rnn_forward.1
= control target key start
LH: loop header
LB: loop body
LE: loop exit
PB: predicated region body
PF: predicated region fallthrough
CT: control target
= control target key end

     0   :  { %v340_v2 = vmov 0   ;;  %v341_v20 = vmov 0.0   ;;  %s692_s2 = inlined_call_operand.vmem [shape: f32[128,128], index: 2, kind: input, shape index: {}]   ;;  %s693_s0 = inlined_call_operand.vmem [shape: f32[64,1], index: 0, kind: input, shape index: {}]   ;;  %s694_s1 = inlined_call_operand.vmem [shape: f32[1,128], index: 1, kind: input, shape index: {}]   ;;  %s695_s3 = inlined_call_operand.vmem [shape: f32[1,128], index: 3, kind: input, shape index: {}]   ;;  %s696_s4 = inlined_call_operand.vmem [shape: f32[128,128], index: 4, kind: input, shape index: {}]   ;;  %s697_s5 = inlined_call_operand.vmem [shape: f32[1,128], index: 5, kind: input, shape index: {}]   ;;  %s698_s6 = inlined_call_operand.vmem [shape: f32[8,128], index: 6, kind: output, shape index: {}]  }
   0x1   :  { %v380_v0 = vld [vmem:[%s692_s2 + $0x78] sm:$0xff]  ;;  %v385_v1 = vld [vmem:[%s692_s2 + $0x70] sm:$0xff]  ;;  %334 = vset.pattern.permute.xlu0 %v340_v2  ;;  %335 = vset.pattern.permute.xlu1 %v340_v2  ;;  %v394_v3 = vld [vmem:[%s692_s2 + $0x68] sm:$0xff] }
   0x2   :  { %111 = vmatpush.msra.mxu0 %v380_v0  ;;  %133 = vmatpush.msra.mxu1 %v380_v0  ;;  %v403_v4 = vld [vmem:[%s692_s2 + $0x60] sm:$0xff]  ;;  %v414_v6 = vld [vmem:[%s692_s2 + $0x58] sm:$0xff]  ;;  %v423_v7 = vld [vmem:[%s692_s2 + $0x50] sm:$0xff] }
   0x3   :  { %155 = vmatpush.msra.mxu2 %v380_v0  ;;  %177 = vmatpush.msra.mxu3 %v380_v0  ;;  %v23_v5 = vld [vmem:[%s693_s0] sm:$0xff]  ;;  %v432_v8 = vld [vmem:[%s692_s2 + $0x48] sm:$0xff]  ;;  %v452_v11 = vld [vmem:[%s692_s2 + $0x38] sm:$0xff] }
   0x4   :  { %112 = vmatpush.msra.mxu0 %v385_v1  ;;  %134 = vmatpush.msra.mxu1 %v385_v1  ;;  %v24_v9 = vld [vmem:[%s693_s0 + $0x8] sm:$0xff]  ;;  %v444_v10 = vld [vmem:[%s692_s2 + $0x40] sm:$0xff]  ;;  %v461_v12 = vld [vmem:[%s692_s2 + $0x30] sm:$0xff] }
   0x5   :  { %156 = vmatpush.msra.mxu2 %v385_v1  ;;  %178 = vmatpush.msra.mxu3 %v385_v1  ;;  %v470_v13 = vld [vmem:[%s692_s2 + $0x28] sm:$0xff]  ;;  %v29_v14 = vld [vmem:[%s693_s0 + $0x30] sm:$0xff]  ;;  %v482_v15 = vld [vmem:[%s692_s2 + $0x20] sm:$0xff] }
   0x6   :  { %113 = vmatpush.msra.mxu0 %v394_v3  ;;  %34 = vperm.xlu0 %334, %v23_v5   ;;  %v490_v16 = vld [vmem:[%s692_s2 + $0x18] sm:$0xff]  ;;  %v499_v17 = vld [vmem:[%s692_s2 + $0x10] sm:$0xff]  ;;  %v508_v18 = vld [vmem:[%s692_s2 + $0x8] sm:$0xff] }
   0x7   :  { %135 = vmatpush.msra.mxu1 %v394_v3  ;;  %157 = vmatpush.msra.mxu2 %v394_v3  ;;  %v517_v19 = vld [vmem:[%s692_s2] sm:$0xff]  ;;  %v25_v29 = vld [vmem:[%s693_s0 + $0x10] sm:$0xff]  ;;  %v26_v30 = vld [vmem:[%s693_s0 + $0x18] sm:$0xff] }
   0x8   :  { %114 = vmatpush.msra.mxu0 %v403_v4  ;;  %179 = vmatpush.msra.mxu3 %v394_v3  ;;  %v600_v21 = vld [vmem:[%s694_s1] ss:$0 sm:$0xff]  ;;  %v30_v31 = vld [vmem:[%s693_s0 + $0x38] sm:$0xff]  ;;  %v28_v45 = vld [vmem:[%s693_s0 + $0x28] sm:$0xff] }
   0x9   :  { %136 = vmatpush.msra.mxu1 %v403_v4  ;;  %158 = vmatpush.msra.mxu2 %v403_v4  ;;  %v606_v24 = vld [vmem:[%s695_s3] ss:$0 sm:$0xff]  ;;  %v297_v5 = vld [vmem:[%s696_s4 + $0x50] sm:$0xff] }
   0xa   :  { %115 = vmatpush.msra.mxu0 %v414_v6  ;;  %180 = vmatpush.msra.mxu3 %v403_v4  ;;  %v27_v44 = vld [vmem:[%s693_s0 + $0x20] sm:$0xff] }
   0xb   :  { %137 = vmatpush.msra.mxu1 %v414_v6  ;;  %159 = vmatpush.msra.mxu2 %v414_v6 }
   0xc   :  { %116 = vmatpush.msra.mxu0 %v423_v7  ;;  %181 = vmatpush.msra.mxu3 %v414_v6 }
   0xd   :  { %138 = vmatpush.msra.mxu1 %v423_v7  ;;  %160 = vmatpush.msra.mxu2 %v423_v7 }
   0xe   :  { %117 = vmatpush.msra.mxu0 %v432_v8  ;;  %39 = vperm.xlu0 %334, %v24_v9   ;;  %v293_v9 = vld [vmem:[%s696_s4 + $0x30] sm:$0xff] }
   0xf   :  { %139 = vmatpush.msra.mxu1 %v432_v8  ;;  %161 = vmatpush.msra.mxu2 %v432_v8 }
  0x10   :  { %118 = vmatpush.msra.mxu0 %v444_v10  ;;  %182 = vmatpush.msra.mxu3 %v423_v7 }
  0x11   :  { %140 = vmatpush.msra.mxu1 %v444_v10  ;;  %162 = vmatpush.msra.mxu2 %v444_v10 }
  0x12   :  { %119 = vmatpush.msra.mxu0 %v452_v11  ;;  %183 = vmatpush.msra.mxu3 %v432_v8 }
  0x13   :  { %141 = vmatpush.msra.mxu1 %v452_v11  ;;  %163 = vmatpush.msra.mxu2 %v452_v11 }
  0x14   :  { %120 = vmatpush.msra.mxu0 %v461_v12  ;;  %184 = vmatpush.msra.mxu3 %v444_v10 }
  0x15   :  { %142 = vmatpush.msra.mxu1 %v461_v12  ;;  %164 = vmatpush.msra.mxu2 %v461_v12 }
  0x16   :  { %121 = vmatpush.msra.mxu0 %v470_v13  ;;  %64 = vperm.xlu0 %334, %v29_v14   ;;  %v290_v14 = vld [vmem:[%s696_s4 + $0x18] sm:$0xff] }
  0x17   :  { %143 = vmatpush.msra.mxu1 %v470_v13  ;;  %165 = vmatpush.msra.mxu2 %v470_v13 }
  0x18   :  { %122 = vmatpush.msra.mxu0 %v482_v15  ;;  %185 = vmatpush.msra.mxu3 %v452_v11 }
  0x19   :  { %144 = vmatpush.msra.mxu1 %v482_v15  ;;  %166 = vmatpush.msra.mxu2 %v482_v15 }
  0x1a   :  { %123 = vmatpush.msra.mxu0 %v490_v16  ;;  %186 = vmatpush.msra.mxu3 %v461_v12 }
  0x1b   :  { %145 = vmatpush.msra.mxu1 %v490_v16  ;;  %167 = vmatpush.msra.mxu2 %v490_v16 }
  0x1c   :  { %124 = vmatpush.msra.mxu0 %v499_v17  ;;  %187 = vmatpush.msra.mxu3 %v470_v13 }
  0x1d   :  { %146 = vmatpush.msra.mxu1 %v499_v17  ;;  %168 = vmatpush.msra.mxu2 %v499_v17 }
  0x1e   :  { %125 = vmatpush.msra.mxu0 %v508_v18  ;;  %188 = vmatpush.msra.mxu3 %v482_v15 }
  0x1f   :  { %147 = vmatpush.msra.mxu1 %v508_v18  ;;  %169 = vmatpush.msra.mxu2 %v508_v18 }
  0x20   :  { %126 = vmatpush.msra.mxu0 %v517_v19  ;;  %189 = vmatpush.msra.mxu3 %v490_v16 }
  0x21   :  { %127 = vmatmul.f32.vlgmr.msra.gmra.mxu0 %v341_v20  ;;  %148 = vmatpush.msra.mxu1 %v517_v19  ;;  %v288_v20 = vld [vmem:[%s696_s4 + $0x8] sm:$0xff] }
  0x22   :  { %170 = vmatpush.msra.mxu2 %v517_v19  ;;  %190 = vmatpush.msra.mxu3 %v499_v17 }
  0x23   :  { %199 = vmatpush.msrb.mxu0 %v380_v0  ;;  %336 = vset.pattern.permute.xlu2 %v340_v2  ;;  %v300_v2 = vld [vmem:[%s696_s4 + $0x68] sm:$0xff] }
  0x24   :  { %191 = vmatpush.msra.mxu3 %v508_v18  ;;  %221 = vmatpush.msrb.mxu1 %v380_v0 }
  0x25   :  { %200 = vmatpush.msrb.mxu0 %v385_v1  ;;  %243 = vmatpush.msrb.mxu2 %v380_v0 }
  0x26   :  { %192 = vmatpush.msra.mxu3 %v517_v19  ;;  %222 = vmatpush.msrb.mxu1 %v385_v1 }
  0x27   :  { %201 = vmatpush.msrb.mxu0 %v394_v3  ;;  %244 = vmatpush.msrb.mxu2 %v385_v1 }
  0x28   :  { %223 = vmatpush.msrb.mxu1 %v394_v3  ;;  %265 = vmatpush.msrb.mxu3 %v380_v0  ;;  %v302_v0 = vld [vmem:[%s696_s4 + $0x78] sm:$0xff] }
  0x29   :  { %202 = vmatpush.msrb.mxu0 %v403_v4  ;;  %245 = vmatpush.msrb.mxu2 %v394_v3 }
  0x2a   :  { %224 = vmatpush.msrb.mxu1 %v403_v4  ;;  %266 = vmatpush.msrb.mxu3 %v385_v1  ;;  %v301_v1 = vld [vmem:[%s696_s4 + $0x70] sm:$0xff] }
  0x2b   :  { %203 = vmatpush.msrb.mxu0 %v414_v6  ;;  %246 = vmatpush.msrb.mxu2 %v403_v4 }
  0x2c   :  { %225 = vmatpush.msrb.mxu1 %v414_v6  ;;  %267 = vmatpush.msrb.mxu3 %v394_v3  ;;  %v299_v3 = vld [vmem:[%s696_s4 + $0x60] sm:$0xff] }
  0x2d   :  { %204 = vmatpush.msrb.mxu0 %v423_v7  ;;  %247 = vmatpush.msrb.mxu2 %v414_v6 }
  0x2e   :  { %226 = vmatpush.msrb.mxu1 %v423_v7  ;;  %268 = vmatpush.msrb.mxu3 %v403_v4  ;;  %v298_v4 = vld [vmem:[%s696_s4 + $0x58] sm:$0xff] }
  0x2f   :  { %205 = vmatpush.msrb.mxu0 %v432_v8  ;;  %248 = vmatpush.msrb.mxu2 %v423_v7 }
  0x30   :  { %227 = vmatpush.msrb.mxu1 %v432_v8  ;;  %269 = vmatpush.msrb.mxu3 %v414_v6  ;;  %v296_v6 = vld [vmem:[%s696_s4 + $0x48] sm:$0xff] }
  0x31   :  { %206 = vmatpush.msrb.mxu0 %v444_v10  ;;  %249 = vmatpush.msrb.mxu2 %v432_v8 }
  0x32   :  { %228 = vmatpush.msrb.mxu1 %v444_v10  ;;  %270 = vmatpush.msrb.mxu3 %v423_v7  ;;  %v295_v7 = vld [vmem:[%s696_s4 + $0x40] sm:$0xff] }
  0x33   :  { %207 = vmatpush.msrb.mxu0 %v452_v11  ;;  %250 = vmatpush.msrb.mxu2 %v444_v10 }
  0x34   :  { %229 = vmatpush.msrb.mxu1 %v452_v11  ;;  %271 = vmatpush.msrb.mxu3 %v432_v8  ;;  %v294_v8 = vld [vmem:[%s696_s4 + $0x38] sm:$0xff] }
  0x35   :  { %208 = vmatpush.msrb.mxu0 %v461_v12  ;;  %251 = vmatpush.msrb.mxu2 %v452_v11 }
  0x36   :  { %230 = vmatpush.msrb.mxu1 %v461_v12  ;;  %272 = vmatpush.msrb.mxu3 %v444_v10  ;;  %v292_v10 = vld [vmem:[%s696_s4 + $0x28] sm:$0xff] }
  0x37   :  { %209 = vmatpush.msrb.mxu0 %v470_v13  ;;  %252 = vmatpush.msrb.mxu2 %v461_v12 }
  0x38   :  { %231 = vmatpush.msrb.mxu1 %v470_v13  ;;  %273 = vmatpush.msrb.mxu3 %v452_v11 }
  0x39   :  { %210 = vmatpush.msrb.mxu0 %v482_v15  ;;  %253 = vmatpush.msrb.mxu2 %v470_v13 }
  0x3a   :  { %232 = vmatpush.msrb.mxu1 %v482_v15  ;;  %274 = vmatpush.msrb.mxu3 %v461_v12  ;;  %v291_v12 = vld [vmem:[%s696_s4 + $0x20] sm:$0xff] }
  0x3b   :  { %211 = vmatpush.msrb.mxu0 %v490_v16  ;;  %254 = vmatpush.msrb.mxu2 %v482_v15 }
  0x3c   :  { %233 = vmatpush.msrb.mxu1 %v490_v16  ;;  %275 = vmatpush.msrb.mxu3 %v470_v13 }
  0x3d   :  { %212 = vmatpush.msrb.mxu0 %v499_v17  ;;  %255 = vmatpush.msrb.mxu2 %v490_v16 }
  0x3e   :  { %234 = vmatpush.msrb.mxu1 %v499_v17  ;;  %276 = vmatpush.msrb.mxu3 %v482_v15 }
  0x3f   :  { %213 = vmatpush.msrb.mxu0 %v508_v18  ;;  %256 = vmatpush.msrb.mxu2 %v499_v17 }
  0x40   :  { %235 = vmatpush.msrb.mxu1 %v508_v18  ;;  %277 = vmatpush.msrb.mxu3 %v490_v16 }
  0x41   :  { %214 = vmatpush.msrb.mxu0 %v517_v19  ;;  %257 = vmatpush.msrb.mxu2 %v508_v18 }
  0x42   :  { %236 = vmatpush.msrb.mxu1 %v517_v19  ;;  %278 = vmatpush.msrb.mxu3 %v499_v17 }
  0x43   :  { %258 = vmatpush.msrb.mxu2 %v517_v19  ;;  %44 = vperm.xlu1 %335, %v25_v29  }
  0x44   :  { %279 = vmatpush.msrb.mxu3 %v508_v18  ;;  %54 = vperm.xlu2 %336, %v27_v44  }
  0x45   :  { %307 = vmatpush.msra.mxu0 %v302_v0 }
  0x46   :  { %280 = vmatpush.msrb.mxu3 %v517_v19  ;;  %v289_v19 = vld [vmem:[%s696_s4 + $0x10] sm:$0xff] }
  0x47   :  { %308 = vmatpush.msra.mxu0 %v301_v1 }
  0x49   :  { %309 = vmatpush.msra.mxu0 %v300_v2 }
  0x4b   :  { %49 = vperm.xlu1 %335, %v26_v30   ;;  %310 = vmatpush.msra.mxu0 %v299_v3  ;;  %v339_v30 = vld [vmem:[%s697_s5] ss:$0 sm:$0xff] }
  0x4c   :  { %59 = vperm.xlu2 %336, %v28_v45  }
  0x4d   :  { %311 = vmatpush.msra.mxu0 %v298_v4 }
  0x4f   :  { %312 = vmatpush.msra.mxu0 %v297_v5 }
  0x51   :  { %313 = vmatpush.msra.mxu0 %v296_v6 }
  0x53   :  { %69 = vperm.xlu1 %335, %v30_v31   ;;  %314 = vmatpush.msra.mxu0 %v295_v7 }
  0x55   :  { %315 = vmatpush.msra.mxu0 %v294_v8 }
  0x57   :  { %316 = vmatpush.msra.mxu0 %v293_v9 }
  0x59   :  { %317 = vmatpush.msra.mxu0 %v292_v10 }
  0x5b   :  { %318 = vmatpush.msra.mxu0 %v291_v12 }
  0x5d   :  { %319 = vmatpush.msra.mxu0 %v290_v14 }
  0x5f   :  { %320 = vmatpush.msra.mxu0 %v289_v19 }
  0x61   :  { %321 = vmatpush.msra.mxu0 %v288_v20 }
  0x78   :  { %v35_v22 = vpop.permute.xlu0 %34 }
  0x79   :  { %v75_v23 = vmul.f32 %v600_v21, %v35_v22  ;;  %v287_v22 = vld [vmem:[%s696_s4] sm:$0xff] }
  0x7a   :  { %322 = vmatpush.msra.mxu0 %v287_v22 }
  0x7b   :  { %v87_v25 = vadd.f32 %v606_v24, %v75_v23 }
  0x80   :  { %v40_v32 = vpop.permute.xlu0 %39 }
  0x81   :  { %v76_v33 = vmul.f32 %v600_v21, %v40_v32 }
  0x83   :  { %v88_v34 = vadd.f32 %v606_v24, %v76_v33 }
  0x88   :  { %v65_v11 = vpop.permute.xlu0 %64 }
  0x89   :  { %v81_v13 = vmul.f32 %v600_v21, %v65_v11 }
  0x8b   :  { %v93_v15 = vadd.f32 %v606_v24, %v81_v13 }
  0x9e   :  { %v128_v26 = vpop.f32.mrf.mxu0  ;;  %v55_v52 = vpop.permute.xlu2 %54 }
  0x9f   :  { %v131_v27 = vadd.f32 %v128_v26, %v87_v25  ;;  %v79_v53 = vmul.f32 %v600_v21, %v55_v52 }
  0xa1   :  { %v132_v28 = vmax.f32 %v131_v27, 0.0  ;;  %v91_v54 = vadd.f32 %v606_v24, %v79_v53 }
  0xa3   :  { %149 = vmatmul.f32.vlgmr.msra.gmra.mxu1 %v132_v28 }
  0xa6   :  { %v60_v58 = vpop.permute.xlu2 %59 }
  0xa7   :  { %v80_v59 = vmul.f32 %v600_v21, %v60_v58 }
  0xa9   :  { %v92_v60 = vadd.f32 %v606_v24, %v80_v59 }
  0xb5   :  { %v45_v38 = vpop.permute.xlu1 %44 }
  0xb6   :  { %v77_v39 = vmul.f32 %v600_v21, %v45_v38 }
  0xb8   :  { %v89_v40 = vadd.f32 %v606_v24, %v77_v39 }
  0xbd   :  { %v50_v46 = vpop.permute.xlu1 %49 }
  0xbe   :  { %v78_v47 = vmul.f32 %v600_v21, %v50_v46 }
  0xc0   :  { %v90_v48 = vadd.f32 %v606_v24, %v78_v47 }
  0xc5   :  { %v70_v23 = vpop.permute.xlu1 %69 }
  0xc6   :  { %v82_v25 = vmul.f32 %v600_v21, %v70_v23 }
  0xc8   :  { %v94_v26 = vadd.f32 %v606_v24, %v82_v25 }
 0x120   :  { %v150_v35 = vpop.f32.mrf.mxu1 }
 0x121   :  { %v153_v36 = vadd.f32 %v150_v35, %v88_v34 }
 0x123   :  { %v154_v37 = vmax.f32 %v153_v36, 0.0 }
 0x125   :  { %171 = vmatmul.f32.vlgmr.msra.gmra.mxu2 %v154_v37 }
 0x1a8   :  { %v172_v41 = vpop.f32.mrf.mxu2 }
 0x1a9   :  { %v175_v42 = vadd.f32 %v172_v41, %v89_v40 }
 0x1ab   :  { %v176_v43 = vmax.f32 %v175_v42, 0.0 }
 0x1ad   :  { %193 = vmatmul.f32.vlgmr.msra.gmra.mxu3 %v176_v43 }
 0x230   :  { %v194_v49 = vpop.f32.mrf.mxu3 }
 0x231   :  { %v197_v50 = vadd.f32 %v194_v49, %v90_v48 }
 0x233   :  { %v198_v51 = vmax.f32 %v197_v50, 0.0 }
 0x235   :  { %215 = vmatmul.f32.vlgmr.msrb.gmra.mxu0 %v198_v51 }
 0x2b2   :  { %v216_v55 = vpop.f32.mrf.mxu0 }
 0x2b3   :  { %v219_v56 = vadd.f32 %v216_v55, %v91_v54 }
 0x2b5   :  { %v220_v57 = vmax.f32 %v219_v56, 0.0 }
 0x2b7   :  { %237 = vmatmul.f32.vlgmr.msrb.gmra.mxu1 %v220_v57 }
 0x334   :  { %v238_v61 = vpop.f32.mrf.mxu1 }
 0x335   :  { %v241_v62 = vadd.f32 %v238_v61, %v92_v60 }
 0x337   :  { %v242_v63 = vmax.f32 %v241_v62, 0.0 }
 0x339   :  { %259 = vmatmul.f32.vlgmr.msrb.gmra.mxu2 %v242_v63 }
 0x3bc   :  { %v260_v16 = vpop.f32.mrf.mxu2 }
 0x3bd   :  { %v263_v17 = vadd.f32 %v260_v16, %v93_v15 }
 0x3bf   :  { %v264_v18 = vmax.f32 %v263_v17, 0.0 }
 0x3c1   :  { %281 = vmatmul.f32.vlgmr.msrb.gmra.mxu3 %v264_v18 }
 0x444   :  { %v282_v27 = vpop.f32.mrf.mxu3 }
 0x445   :  { %v285_v28 = vadd.f32 %v282_v27, %v94_v26 }
 0x447   :  { %v286_v29 = vmax.f32 %v285_v28, 0.0 }
 0x449   :  { %323 = vmatmul.f32.vlgmr.msra.gmra.mxu0 %v286_v29 }
 0x4c6   :  { %v324_v31 = vpop.f32.mrf.mxu0 }
 0x4c7   :  { %v325_v32 = vadd.f32 %v339_v30, %v324_v31 }
 0x4c9   :  { %327 = vst [vmem:[%s698_s6] sm:$0xff] %v325_v32 }

</bundles_post_ra>
